<compile_context>
chip_gen: v5e
topology: v5e:2x2
jax: 0.10.0
libtpu: 0.0.40
codegen_flags: <defaults>
</compile_context>

<pallas_src>
import functools

import jax
import jax.numpy as jnp
from jax.experimental import pallas as pl
from jax.experimental.pallas import tpu as pltpu


def _rowwise_sumsq_kernel(pred_ref, gt_ref, out_ref, *, hw, hw_block,
                          mask_last_hw):
    """out[row] = sum over HW of (pred - gt)^2, accumulated over the hw grid axis."""
    h = pl.program_id(1)

    @pl.when(h == 0)
    def _():
        out_ref[...] = jnp.zeros_like(out_ref)

    d = pred_ref[...].astype(jnp.float32) - gt_ref[...].astype(jnp.float32)
    sq = d * d
    if mask_last_hw:
        # Only needed when HW is tiled and the last hw block is partial.
        col = h * hw_block + jax.lax.broadcasted_iota(jnp.int32, sq.shape, 1)
        sq = jnp.where(col < hw, sq, 0.0)
    out_ref[...] += jnp.sum(sq, axis=1, keepdims=True)          # (bj_tile, 1)


def _ceil_to(x, m):
    return ((x + m - 1) // m) * m


def _detect_vmem_bytes(default=64 * 1024 * 1024):
    """Physical VMEM per TensorCore; conservative (v7x-safe) default if unknown."""
    try:
        info = pltpu.get_tpu_info()
        for name in ("vmem_capacity_bytes", "vmem_bytes", "vmem_size_bytes"):
            v = getattr(info, name, None)
            if v:
                return int(v)
    except Exception:
        pass
    return default


def joints_ohkm_mse_loss(output, target, target_weight,
                         use_target_weight=True, topk=8,
                         vmem_budget_bytes=None, vmem_limit_bytes=None):
    """output/target: (B, J, H, W); target_weight: (B, J, 1). Returns scalar loss."""
    B, J, H, W = output.shape
    if topk > J:
        raise ValueError(f"topk={topk} must be <= num_joints={J}")
    HW = H * W
    BJ = B * J

    # (B*J, HW) layout, native dtype (bf16 stays bf16 -> half the HBM bytes).
    pred = output.reshape(BJ, HW)
    gt = target.reshape(BJ, HW)
    itemsize = jnp.dtype(pred.dtype).itemsize

    # ---- generation-aware VMEM budgeting -----------------------------------
    phys_vmem = _detect_vmem_bytes()
    if vmem_budget_bytes is None:
        # v5e/v6e (128 MiB) -> 48 MiB block budget; v7x (64 MiB/TC) -> 24 MiB.
        vmem_budget_bytes = (phys_vmem * 3) // 8
    if vmem_limit_bytes is None:
        vmem_limit_bytes = min((phys_vmem * 3) // 4, 112 * 1024 * 1024)

    # dtype-aware sublane multiple for the (second-minor) B*J axis.
    sub = max(8, 32 // itemsize)          # 8 f32, 16 bf16, 32 int8/fp8

    # Bytes resident in VMEM per row of a full-HW block:
    #   2 native-dtype input streams x 2 pipeline buffers + ~1 f32 temporary
    #   + lane-padded (bj_tile, 1) f32 out double buffer.
    per_row_bytes = 4 * HW * itemsize + 4 * HW + 1024
    max_rows = (vmem_budget_bytes // per_row_bytes // sub) * sub

    if max_rows >= sub:
        # Main path: whole HW in one contiguous block, no reduction loop.
        hw_block = HW
        bj_tile = min(max_rows, _ceil_to(BJ, sub))
        # Keep >= 4 B*J tiles (even count) when the problem is big enough, so
        # double-buffering stays active and v7x's two cores both get work.
        min_tiles = 4
        if BJ >= min_tiles * sub:
            ntiles = max(min_tiles, pl.cdiv(BJ, bj_tile))
            if ntiles % 2:
                ntiles += 1
            bj_tile = min(bj_tile, max(sub, _ceil_to(pl.cdiv(BJ, ntiles), sub)))
    else:
        # Fallback for enormous heatmaps: shrink bj_tile to the minimum first,
        # then tile HW with the largest 128-multiple that fits the budget.
        bj_tile = sub
        per_col_bytes = bj_tile * (4 * itemsize + 4)
        hw_block = max(128, (vmem_budget_bytes // per_col_bytes // 128) * 128)
        hw_block = min(hw_block, _ceil_to(HW, 128))

    grid = (pl.cdiv(BJ, bj_tile), pl.cdiv(HW, hw_block))
    kernel = functools.partial(
        _rowwise_sumsq_kernel,
        hw=HW, hw_block=hw_block, mask_last_hw=(HW % hw_block != 0))

    per_row = pl.pallas_call(
        kernel,
        out_shape=jax.ShapeDtypeStruct((BJ, 1), jnp.float32),
        grid_spec=pltpu.PrefetchScalarGridSpec(
            num_scalar_prefetch=0,
            grid=grid,
            in_specs=[
                pl.BlockSpec((bj_tile, hw_block), lambda i, h: (i, h)),
                pl.BlockSpec((bj_tile, hw_block), lambda i, h: (i, h)),
            ],
            out_specs=pl.BlockSpec((bj_tile, 1), lambda i, h: (i, 0)),
        ),
        compiler_params=pltpu.CompilerParams(
            dimension_semantics=("parallel", "arbitrary"),
            vmem_limit_bytes=int(vmem_limit_bytes)),
    )(pred, gt)

    # ---- epilogue on the tiny (B, J) per-joint losses -----------------------
    per_joint = per_row[:, 0].reshape(B, J) * (0.5 / HW)
    if use_target_weight:
        w = target_weight.reshape(B, J).astype(jnp.float32)
        per_joint = per_joint * (w * w)
    # OHKM: per-sample top-k over joints, sum/topk, mean over batch.
    topv, _ = jax.lax.top_k(per_joint, topk)
    return jnp.mean(jnp.sum(topv, axis=1) / topk)


def _reference(output, target, target_weight, use_target_weight=True, topk=8):
    B, J, H, W = output.shape
    pred = output.reshape(B, J, -1).astype(jnp.float32)
    gt = target.reshape(B, J, -1).astype(jnp.float32)
    if use_target_weight:
        w = target_weight.reshape(B, J, 1).astype(jnp.float32)
    else:
        w = jnp.ones((B, J, 1), jnp.float32)
    per_joint = 0.5 * jnp.mean((w * pred - w * gt) ** 2, axis=2)   # (B, J)
    topv, _ = jax.lax.top_k(per_joint, topk)
    return jnp.mean(jnp.sum(topv, axis=1) / topk)


if __name__ == "__main__":
    key = jax.random.PRNGKey(0)
    k1, k2, k3 = jax.random.split(key, 3)

    B, J, H, W = 2, 16, 16, 16   # num_joints=16 >= topk=8
    output = jax.random.normal(k1, (B, J, H, W), jnp.float32)
    target = jax.random.normal(k2, (B, J, H, W), jnp.float32)
    target_weight = jax.random.uniform(k3, (B, J, 1), jnp.float32)

    # f32, with target_weight.
    loss = jax.block_until_ready(
        joints_ohkm_mse_loss(output, target, target_weight, True, 8))
    ref = jax.block_until_ready(_reference(output, target, target_weight, True, 8))
    assert jnp.allclose(loss, ref, rtol=1e-5, atol=1e-6), (loss, ref)

    # f32, without target_weight.
    loss_nw = jax.block_until_ready(
        joints_ohkm_mse_loss(output, target, target_weight, False, 8))
    ref_nw = jax.block_until_ready(_reference(output, target, target_weight, False, 8))
    assert jnp.allclose(loss_nw, ref_nw, rtol=1e-5, atol=1e-6), (loss_nw, ref_nw)

    # bf16 heatmaps (exercises the dtype-aware sublane path; math stays f32).
    out_bf = output.astype(jnp.bfloat16)
    tgt_bf = target.astype(jnp.bfloat16)
    loss_bf = jax.block_until_ready(
        joints_ohkm_mse_loss(out_bf, tgt_bf, target_weight, True, 8))
    ref_bf = jax.block_until_ready(_reference(out_bf, tgt_bf, target_weight, True, 8))
    assert jnp.allclose(loss_bf, ref_bf, rtol=1e-4, atol=1e-5), (loss_bf, ref_bf)

    print("KERNEL_OK")
</pallas_src>

<mosaic_0001>
module attributes {stable_mosaic.version = 11 : i64} {
  func.func @_rowwise_sumsq_kernel(%arg0: i32, %arg1: i32, %arg2: memref<8x256xf32, #tpu.memory_space<vmem>>, %arg3: memref<8x256xf32, #tpu.memory_space<vmem>>, %arg4: memref<8x1xf32, #tpu.memory_space<vmem>>) attributes {dimension_semantics = [#tpu.dimension_semantics<parallel>, #tpu.dimension_semantics<arbitrary>], iteration_bounds = array<i64: 4, 1>, scalar_prefetch = 0 : i64, scratch_operands = 0 : i64, tpu.core_type = #tpu.core_type<tc>, window_params = [{transform_indices = @transform_0, window_bounds = array<i64: 8, 256>}, {transform_indices = @transform_1, window_bounds = array<i64: 8, 256>}, {transform_indices = @transform_2, window_bounds = array<i64: 8, 1>}]} {
    %c0_i32 = arith.constant 0 : i32
    %0 = arith.cmpi eq, %arg1, %c0_i32 : i32
    %1 = arith.extui %0 : i1 to i32
    %c0_i32_0 = arith.constant 0 : i32
    %2 = arith.cmpi ne, %1, %c0_i32_0 : i32
    scf.if %2 {
      %cst_8 = arith.constant 0.000000e+00 : f32
      %12 = vector.broadcast %cst_8 : f32 to vector<8x1xf32>
      %c0_9 = arith.constant 0 : index
      %c0_10 = arith.constant 0 : index
      %13 = vector.load %arg4[%c0_9, %c0_10] : memref<8x1xf32, #tpu.memory_space<vmem>>, vector<8x1xf32>
      tpu.vector_store %arg4[%c0_9, %c0_10], %12 {strides = array<i32>} : memref<8x1xf32, #tpu.memory_space<vmem>>, vector<8x1xf32>,
    } else {
    }
    %c0 = arith.constant 0 : index
    %c0_1 = arith.constant 0 : index
    %3 = vector.load %arg2[%c0, %c0_1] : memref<8x256xf32, #tpu.memory_space<vmem>>, vector<8x256xf32>
    %c0_2 = arith.constant 0 : index
    %c0_3 = arith.constant 0 : index
    %4 = vector.load %arg3[%c0_2, %c0_3] : memref<8x256xf32, #tpu.memory_space<vmem>>, vector<8x256xf32>
    %5 = arith.subf %3, %4 : vector<8x256xf32>
    %6 = arith.mulf %5, %5 : vector<8x256xf32>
    %c0_4 = arith.constant 0 : index
    %c0_5 = arith.constant 0 : index
    %7 = vector.load %arg4[%c0_4, %c0_5] : memref<8x1xf32, #tpu.memory_space<vmem>>, vector<8x1xf32>
    %cst = arith.constant dense<0.000000e+00> : vector<8xf32>
    %8 = vector.multi_reduction <add>, %6, %cst [1] : vector<8x256xf32> to vector<8xf32>
    %9 = vector.shape_cast %8 : vector<8xf32> to vector<8x1xf32>
    %10 = arith.addf %7, %9 : vector<8x1xf32>
    %c0_6 = arith.constant 0 : index
    %c0_7 = arith.constant 0 : index
    %11 = vector.load %arg4[%c0_6, %c0_7] : memref<8x1xf32, #tpu.memory_space<vmem>>, vector<8x1xf32>
    tpu.vector_store %arg4[%c0_6, %c0_7], %10 {strides = array<i32>} : memref<8x1xf32, #tpu.memory_space<vmem>>, vector<8x1xf32>,
    return
  }
  func.func @transform_0(%arg0: i32, %arg1: i32) -> (i32, i32) {
    %c0_i32 = arith.constant 0 : i32
    return %arg0, %arg1 : i32, i32
  }
  func.func @transform_1(%arg0: i32, %arg1: i32) -> (i32, i32) {
    %c0_i32 = arith.constant 0 : i32
    return %arg0, %arg1 : i32, i32
  }
  func.func @transform_2(%arg0: i32, %arg1: i32) -> (i32, i32) {
    %c0_i32 = arith.constant 0 : i32
    %c0_i32_0 = arith.constant 0 : i32
    return %arg0, %c0_i32 : i32, i32
  }
}

</mosaic_0001>

<bundles_post_ra>
// kernel: tpu_custom_call.1
= control target key start
LH: loop header
LB: loop body
LE: loop exit
PB: predicated region body
PF: predicated region fallthrough
CT: control target
= control target key end

     0   :  { %7 = vsyncpa [#allocation3], 0  ;;  %s655_s0 = inlined_call_operand.hbm [shape: f32[32,256], index: 0, kind: input, shape index: {}]   ;;  %s656_s1 = inlined_call_operand.hbm [shape: f32[32,256], index: 1, kind: input, shape index: {}]   ;;  %s657_s2 = inlined_call_operand.vmem [shape: f32[32,1], index: 2, kind: output, shape index: {}]  }
   0x1   :  { %9 = vsyncpa [#allocation3 + $0x1], 0 }
   0x2   :  { %10 = vsyncpa [#allocation5], 0 }
   0x3   :  { %12 = vsyncpa [#allocation5 + $0x1], 0  ;;  %s558_s9 = smov 0   ;;  %s560_s10 = smov 0  }
   0x4   :  { %s562_s11 = smov 0   ;;  %s564_s12 = smov 0  }
   0x5   :  { %s566_s13 = smov 0   ;;  %s568_s14 = smov 0  }
   0x6 LB: > { %s347_s15 = sadd.s32 4294967295, %s540_s14   ;;  %s30_s16 = sadd.s32 1, %s536_s13  ;;  %s540_s14 = sphi %s568_s14, %s18_s14   ;;  %s536_s13 = sphi %s566_s13, %s664_s13   ;;  %s532_s12 = sphi %s564_s12, %s663_s12   ;;  %s528_s11 = sphi %s562_s11, %s662_s11   ;;  %s524_s10 = sphi %s560_s10, %s661_s10   ;;  %s520_s9 = sphi %s558_s9, %s660_s9  }
   0x7   : > { %p32_p0 = scmp.ge.s32.totalorder %s30_s16, 4  ;;  %s39_s17 = sadd.s32 1, %s528_s11 }
   0x8   : > { %p46_p1 = scmp.ne.s32.totalorder %s528_s11, %s524_s10  ;;  %p47_p2 = scmp.eq.s32.totalorder %s540_s14, 0 }
   0x9   : > { %s666_s16 = smov (%p32_p0, %s30_s16), 0  ;;  %p52_p4 = scmp.ne.s32.totalorder %s524_s10, %s520_s9 }
   0xa   : > { %p594_p3 = por %p47_p2, %p46_p1  ;;  %s34_s19 = ssub.s32 %s536_s13, %s666_s16 }
   0xb   : > { %p53_p5 = scmp.eq.s32.totalorder %s347_s15, 0  ;;  %p37_p6 = scmp.eq.s32.totalorder %s34_s19, 0 }
   0xc   : > { %p376_p8 = scmp.lt.s32.totalorder %s540_s14, 4  ;;  %s130_s22 = sand.u32 1, %s528_s11  }
   0xd   : > { %p601_p7 = por %p53_p5, %p52_p4  ;;  %s363_s23 = sshll.u32 %s536_s13, 4 }
   0xe   : > { %s607_s21 = scalar_select %p37_p6, %s528_s11, %s39_s17  }
   0xf   : > { %s351_s24 = sshll.u32 %s130_s22, 4  ;;  %s141_s27 = scalar_lea.hbm %s655_s0, %s363_s23 }
  0x10   : > { %s143_s28 = sshll.u32 %s141_s27, 4  ;;  %s134_s29 = scalar_lea.vmem [#allocation2], %s351_s24  ;;  %s144_s28 = int_to_ptr.hbm [resolvable:$true] %s143_s28 }
  0x11   : > { %s145_s30 = sshll.u32 %s134_s29, 4  ;;  %p370_p9 = pnand %p376_p8, %p594_p3  ;;  %s146_s30 = int_to_ptr.vmem [resolvable:$true] %s145_s30 }
  0x12   : > { %p357_p10 = scmp.ge.s32.totalorder %s540_s14, 1  ;;  %p172_p11 = scmp.lt.s32.totalorder %s540_s14, 5 }
  0x13   : > { %s131_s3 = scalar_lea.sflag [#allocation3], %s130_s22  ;;  %s163_s6 = scalar_lea.hbm %s656_s1, %s363_s23 }
  0x14   : > { %372 = dma.hbm_to_vmem [thread:$0]  (!%p370_p9), %s144_s28, 256, %s146_s30, %s131_s3  }
  0x15   : > { %p173_p12 = pnand %p357_p10, %p172_p11  ;;  %s165_s7 = sshll.u32 %s163_s6, 4  ;;  %s166_s7 = int_to_ptr.hbm [resolvable:$true] %s165_s7 }
  0x16   : > { %s156_s8 = scalar_lea.vmem [#allocation4], %s351_s24  ;;  %s153_s15 = scalar_lea.sflag [#allocation5], %s130_s22 }
  0x17   : > { %s167_s9 = sshll.u32 %s156_s8, 4  ;;  %176 = sbr.rel (%p173_p12) target bundleno = 158 (0x9e), region = 28  ;;  %s168_s9 = int_to_ptr.vmem [resolvable:$true] %s167_s9 }
  0x18   : > { %375 = dma.hbm_to_vmem [thread:$0]  (!%p370_p9), %s166_s7, 256, %s168_s9, %s153_s15  }
  0x19   : > { %s178_s17 = sand.u32 (!%p173_p12), 1, %s524_s10  }
  0x1a   : > { %s358_s18 = sshll.u32 (!%p173_p12), %s178_s17, 4  ;;  %s179_s19 = scalar_lea.sflag (!%p173_p12), [#allocation3], %s178_s17 }
  0x1b   : > { %s182_s25 = scalar_lea.vmem (!%p173_p12), [#allocation2], %s358_s18 }
  0x1c   : > { %511 = dma.done.wait (%p601_p7), %s179_s19, 256  }
  0x1d   : > { %513 = vsyncadd (%p601_p7), %s179_s19, 4294967040  ;;  %s189_s23 = scalar_lea.sflag [#allocation5], %s178_s17  ;;  %s192_s24 = scalar_lea.vmem [#allocation4], %s358_s18 }
  0x1e   : > { %515 = dma.done.wait (%p601_p7), %s189_s23, 256  }
  0x1f   : > { %517 = vsyncadd (%p601_p7), %s189_s23, 4294967040  ;;  %p220_p13 = scmp.lt.s32.totalorder %s532_s12, 3  ;;  %vm228_vm0 = vcmask 7168   ;;  %v542_v0 = vmov 0.0   ;;  %v230_v1 = vld [vmem:[%s182_s25] sm:$0xff]  ;;  %v231_v2 = vld [vmem:[%s182_s25 + $0x8] sm:$0xff] }
  0x20   : > { %v232_v3 = vld [vmem:[%s192_s24] sm:$0xff]  ;;  %v233_v4 = vld [vmem:[%s192_s24 + $0x8] sm:$0xff] }
  0x21   : > { %s668_s12 = smov (!%p220_p13, %s532_s12), 3  ;;  %v234_v5 = vsub.f32 %v230_v1, %v232_v3  ;;  %v235_v6 = vsub.f32 %v231_v2, %v233_v4 }
  0x22   : > { %s360_s22 = sshll.u32 %s668_s12, 3 }
  0x23   : > { %s223_s28 = scalar_lea.vmem %s657_s2, %s360_s22  ;;  %v236_v7 = vmul.f32 %v234_v5, %v234_v5  ;;  %v237_v8 = vmul.f32 %v235_v6, %v235_v6 }
  0x24   : > { %229 = vst.msk [vmem:[%s223_s28] sm:$0xff] %vm228_vm0, %v542_v0 }
  0x25   : > { %v239_v9 = vadd.f32 %v237_v8, %v236_v7 }
  0x27   : > { %240 = vadd.xlane.f32.xlu0 %v239_v9 }
  0x2b   : > { %v238_v10 = vld [vmem:[%s223_s28] sm:$0xff] }
  0x9a   : > { %v241_v11 = vpop.xlane.xlu0 %240 }
  0x9b   : > { %v242_v12 = vadd.f32 %v241_v11, %v238_v10 }
  0x9d   : > { %244 = vst.msk [vmem:[%s223_s28] sm:$0xff] %vm228_vm0, %v242_v12 }
  0x9e PF: > { %s18_s14 = sadd.s32 1, %s540_s14   ;;  %s660_s9 = smov %s524_s10 }
  0x9f   : > { %p15_p0 = scmp.ge.s32.totalorder %s18_s14, 6   ;;  %s661_s10 = smov %s528_s11 }
  0xa0   : > { %s662_s11 = smov %s607_s21  ;;  %s663_s12 = smov %s536_s13 }
  0xa1   : > { %s664_s13 = smov %s666_s16  ;;  %17 = sbr.rel (!%p15_p0) target bundleno = 6 (0x6), region = 85 }
  0xa6   :  { %264 = vsyncpa [#allocation3], 1 }
  0xa7   :  { %266 = vsyncpa [#allocation3 + $0x1], 1 }
  0xa8   :  { %267 = vsyncpa [#allocation5], 1 }
  0xa9   :  { %269 = vsyncpa [#allocation5 + $0x1], 1 }

</bundles_post_ra>
